<compile_context>
chip_gen: v6e
topology: v6e:2x2x1
jax: 0.10.0
libtpu: 0.0.40
codegen_flags: <defaults>
</compile_context>

<pallas_src>
import functools

import jax
import jax.numpy as jnp
from jax.experimental import pallas as pl
from jax.experimental.pallas import tpu as pltpu


# ----------------------------- VMEM budgeting --------------------------------
def _vmem_budget_bytes():
    """75% of physical VMEM; conservative 48 MiB fallback (v7x has 64 MiB)."""
    phys = 0
    try:
        info = pltpu.get_tpu_info()
        phys = int(getattr(info, "vmem_capacity_bytes", 0) or 0)
    except Exception:
        phys = 0
    if phys <= 0:
        phys = 64 * 1024 * 1024
    return (phys * 3) // 4


# ----------------------------- Pallas kernels --------------------------------
def _make_matmul_kernel(*, apply_relu, has_bias, k_grid, tk, y_resident):
    """Build a matmul kernel body for the given configuration."""

    def _epilogue(acc, b_ref, o_ref):
        out = acc
        if has_bias:
            out = out + b_ref[...]            # f32 bias add
        if apply_relu:
            out = jnp.maximum(out, 0.0)
        o_ref[...] = out.astype(o_ref.dtype)

    if k_grid == 1:
        # Single K step: skip the VMEM accumulator entirely.
        def kernel(x_ref, y_ref, *rest):
            b_ref = rest[0] if has_bias else None
            o_ref = rest[-1]
            acc = jnp.dot(x_ref[...], y_ref[...],
                          preferred_element_type=jnp.float32)
            _epilogue(acc, b_ref, o_ref)

        return kernel

    def kernel(x_ref, y_ref, *rest):
        b_ref = rest[0] if has_bias else None
        o_ref = rest[-2]
        acc_ref = rest[-1]
        kk = pl.program_id(2)

        @pl.when(kk == 0)
        def _():
            acc_ref[...] = jnp.zeros_like(acc_ref)

        if y_resident:
            # Y is the whole [K, tn] slab (DMA'd once); slice the K chunk.
            start = pl.multiple_of(kk * tk, tk)
            y_tile = y_ref[pl.ds(start, tk), :]
        else:
            y_tile = y_ref[...]

        acc_ref[...] += jnp.dot(x_ref[...], y_tile,
                                preferred_element_type=jnp.float32)

        @pl.when(kk == k_grid - 1)
        def _():
            _epilogue(acc_ref[...], b_ref, o_ref)

    return kernel


# ----------------------------- tiling helpers --------------------------------
def _pick_tile(dim, cap):
    for t in (2048, 1024, 512, 256, 128):
        if t <= cap and dim % t == 0:
            return t
    return dim  # dims are always padded to 128-multiples


def _pick_tm(m, cap=1024):
    # Prefer >= 2 row tiles so the parallel M axis can shard across the two
    # TensorCores of a v7x megacore (no-op on single-TC v5e/v6e).
    for t in (1024, 512, 256, 128):
        if t <= cap and m % t == 0 and m // t >= 2:
            return t
    return _pick_tile(m, cap)


def tiled_matmul(x, y, bias=None, *, apply_relu=False, out_dtype=jnp.float32):
    """O = X @ Y (+ bias) (+ ReLU), tiled for the MXU, f32 accumulation.

    x: [M, K] bf16, y: [K, N] bf16, bias: [N] f32 or None.
    M, K, N are multiples of 128.
    """
    m, k = x.shape
    k2, n = y.shape
    assert k == k2, (x.shape, y.shape)
    has_bias = bias is not None

    tn = _pick_tile(n, 256)
    tm = _pick_tm(m, 1024)
    tk = _pick_tile(k, 512)

    budget = _vmem_budget_bytes()
    x_it = x.dtype.itemsize
    y_it = y.dtype.itemsize
    o_it = jnp.dtype(out_dtype).itemsize

    def _vmem_use(tm_, tk_, y_rows):
        return (2 * tm_ * tk_ * x_it          # double-buffered X tiles
                + 2 * y_rows * tn * y_it      # Y tiles (or resident slab)
                + 2 * tm_ * tn * o_it         # double-buffered output tiles
                + tm_ * tn * 4                # f32 accumulator
                + (2 * tn * 4 if has_bias else 0))

    # Shrink tm if even plain tiling overflows the per-generation budget.
    while tm > 128 and _vmem_use(tm, tk, tk) > budget:
        tm //= 2

    k_grid = k // tk
    # Keep Y (= H@W) fully VMEM-resident when it fits: removes every
    # (M/tm - 1) re-read of Y from HBM on the mem-bound A_hat @ HW call.
    y_resident = (k_grid > 1) and (_vmem_use(tm, tk, k) <= budget)

    kernel = _make_matmul_kernel(apply_relu=apply_relu, has_bias=has_bias,
                                 k_grid=k_grid, tk=tk, y_resident=y_resident)

    if k_grid == 1:
        grid = (m // tm, n // tn)
        x_spec = pl.BlockSpec((tm, k), lambda i, j: (i, 0))
        y_spec = pl.BlockSpec((k, tn), lambda i, j: (0, j))
        b_spec = pl.BlockSpec((1, tn), lambda i, j: (0, j))
        o_spec = pl.BlockSpec((tm, tn), lambda i, j: (i, j))
        scratch = []
        dims = ("parallel", "parallel")
        x_reads = 1
        y_reads = 1 if (n // tn) == 1 else (m // tm)
    else:
        grid = (m // tm, n // tn, k_grid)
        x_spec = pl.BlockSpec((tm, tk), lambda i, j, kk: (i, kk))
        if y_resident:
            y_spec = pl.BlockSpec((k, tn), lambda i, j, kk: (0, j))
        else:
            y_spec = pl.BlockSpec((tk, tn), lambda i, j, kk: (kk, j))
        b_spec = pl.BlockSpec((1, tn), lambda i, j, kk: (0, j))
        o_spec = pl.BlockSpec((tm, tn), lambda i, j, kk: (i, j))
        scratch = [pltpu.VMEM((tm, tn), jnp.float32)]
        dims = ("parallel", "parallel", "arbitrary")
        x_reads = n // tn
        y_reads = 1 if y_resident else (m // tm)

    in_specs = [x_spec, y_spec]
    args = [x, y]
    if has_bias:
        in_specs.append(b_spec)
        args.append(bias.reshape(1, n).astype(jnp.float32))

    flops = 2 * m * n * k
    bytes_accessed = (m * k * x_it * x_reads
                      + k * n * y_it * y_reads
                      + m * n * o_it
                      + (n * 4 if has_bias else 0))

    return pl.pallas_call(
        kernel,
        out_shape=jax.ShapeDtypeStruct((m, n), out_dtype),
        grid_spec=pltpu.PrefetchScalarGridSpec(
            num_scalar_prefetch=0,
            grid=grid,
            in_specs=in_specs,
            out_specs=o_spec,
            scratch_shapes=scratch,
        ),
        compiler_params=pltpu.CompilerParams(
            dimension_semantics=dims,
            vmem_limit_bytes=int(budget),
        ),
        cost_estimate=pl.CostEstimate(
            flops=int(flops), transcendentals=0,
            bytes_accessed=int(bytes_accessed)),
    )(*args)


# ----------------------------- JAX glue ---------------------------------------
def _round_up(v, m):
    return ((v + m - 1) // m) * m


def _pad2d(a, rows, cols):
    r, c = a.shape
    return jnp.pad(a, ((0, rows - r), (0, cols - c)))


def build_normalized_adjacency(edge_index, num_nodes):
    """Dense A_hat = D^{-1/2} (A + I) D^{-1/2} from edge_index [2, E].

    Duplicate edges collapse to weight 1; pre-existing self-loops end up with
    weight 2 after adding I (matches the previous reference behavior).
    """
    row, col = edge_index
    adj = jnp.zeros((num_nodes, num_nodes), jnp.float32)
    adj = adj.at[row, col].set(1.0)
    adj = adj.at[col, row].set(1.0)                      # undirected
    adj = adj + jnp.eye(num_nodes, dtype=jnp.float32)    # self loops
    deg = adj.sum(axis=1)
    d_inv_sqrt = jnp.where(deg > 0, 1.0 / jnp.sqrt(deg), 0.0)
    return adj * d_inv_sqrt[:, None] * d_inv_sqrt[None, :]


def glorot(key, shape):
    fan_in, fan_out = shape
    limit = jnp.sqrt(6.0 / (fan_in + fan_out))
    return jax.random.uniform(key, shape, jnp.float32, -limit, limit)


def ours_gcn_forward(x, edge_index, weights, biases):
    """Forward of Ours with GCN encoder (inference): returns logits [N, c]."""
    num_nodes, d = x.shape
    num_classes = weights[-1].shape[1]

    a_hat = build_normalized_adjacency(edge_index, num_nodes)

    # Pad node dim + feature dims to 128-multiples; cast streams to bf16 once
    # (A_hat bf16 copy is reused across all layers; padded rows/cols are
    # exactly zero, which keeps padded-node garbage out of real rows).
    n_pad = _round_up(num_nodes, 128)
    a_bf16 = _pad2d(a_hat, n_pad, n_pad).astype(jnp.bfloat16)
    # TODO(synk): stream A_hat as int8 (v5e/v6e) / fp8-e4m3 (v7x) with the
    # D^{-1/2} scale folded into an f32 epilogue to halve the dominant HBM stream.
    h = _pad2d(x, n_pad, _round_up(d, 128)).astype(jnp.bfloat16)

    num_layers = len(weights)
    for layer_idx in range(num_layers):
        w, b = weights[layer_idx], biases[layer_idx]
        f_in, f_out = w.shape
        f_in_pad, f_out_pad = _round_up(f_in, 128), _round_up(f_out, 128)
        w_pad = _pad2d(w, f_in_pad, f_out_pad).astype(jnp.bfloat16)
        b_pad = jnp.pad(b, (0, f_out_pad - f_out)).astype(jnp.float32)

        is_last = layer_idx == num_layers - 1

        # 1) HW = H @ W   (small matmul, hoisted; no bias, no ReLU)
        hw = tiled_matmul(h, w_pad, None, apply_relu=False,
                          out_dtype=jnp.bfloat16)
        # 2) OUT = A_hat @ HW + b  (+ ReLU on hidden layers)
        out_dtype = jnp.float32 if is_last else jnp.bfloat16
        h = tiled_matmul(a_bf16, hw, b_pad, apply_relu=not is_last,
                         out_dtype=out_dtype)
        # dropout is identity at inference; use_bn=False

    # TODO(synk): for genuinely sparse graphs a block-sparse SpMM with scalar-
    # prefetched neighbor/row offsets would replace the dense [N,N] A_hat.
    return h[:num_nodes, :num_classes]


# ----------------------------- main -------------------------------------------
if __name__ == "__main__":
    key = jax.random.PRNGKey(0)
    k_x, k_e, k_w0, k_w1 = jax.random.split(key, 4)

    # Small shapes implied by the module: N nodes, d input feats, hidden, c classes
    num_nodes, d, hidden, c = 16, 8, 32, 4
    num_edges = 40

    x = jax.random.normal(k_x, (num_nodes, d), jnp.float32)
    edge_index = jax.random.randint(k_e, (2, num_edges), 0, num_nodes)

    # Deterministic params (glorot weights, zero bias), 2-layer GCN: d->hidden->c
    weights = [glorot(k_w0, (d, hidden)), glorot(k_w1, (hidden, c))]
    biases = [jnp.zeros((hidden,), jnp.float32), jnp.zeros((c,), jnp.float32)]

    logits = ours_gcn_forward(x, edge_index, weights, biases)
    logits = jax.block_until_ready(logits)

    # Sanity check against a pure-JAX f32 reference (bf16 streams -> loose tol)
    a_hat = build_normalized_adjacency(edge_index, num_nodes)
    ref = jnp.maximum(a_hat @ (x @ weights[0]) + biases[0], 0.0)
    ref = a_hat @ (ref @ weights[1]) + biases[1]
    assert logits.shape == (num_nodes, c)
    assert jnp.allclose(logits, ref, atol=5e-2, rtol=5e-2), (
        jnp.max(jnp.abs(logits - ref)))

    print("KERNEL_OK")
</pallas_src>

<mosaic_0001>
module attributes {stable_mosaic.version = 11 : i64} {
  func.func @kernel(%arg0: i32, %arg1: i32, %arg2: memref<128x128xbf16, #tpu.memory_space<vmem>>, %arg3: memref<128x128xbf16, #tpu.memory_space<vmem>>, %arg4: memref<128x128xbf16, #tpu.memory_space<vmem>>) attributes {dimension_semantics = [#tpu.dimension_semantics<parallel>, #tpu.dimension_semantics<parallel>], iteration_bounds = array<i64: 1, 1>, scalar_prefetch = 0 : i64, scratch_operands = 0 : i64, tpu.core_type = #tpu.core_type<tc>, window_params = [{transform_indices = @transform_0, window_bounds = array<i64: 128, 128>}, {transform_indices = @transform_1, window_bounds = array<i64: 128, 128>}, {transform_indices = @transform_2, window_bounds = array<i64: 128, 128>}]} {
    %c0 = arith.constant 0 : index
    %c0_0 = arith.constant 0 : index
    %0 = vector.load %arg2[%c0, %c0_0] : memref<128x128xbf16, #tpu.memory_space<vmem>>, vector<128x128xbf16>
    %c0_1 = arith.constant 0 : index
    %c0_2 = arith.constant 0 : index
    %1 = vector.load %arg3[%c0_1, %c0_2] : memref<128x128xbf16, #tpu.memory_space<vmem>>, vector<128x128xbf16>
    %cst = arith.constant dense<0.000000e+00> : vector<128x128xf32>
    %2 = tpu.matmul %0, %1, %cst {dimension_numbers = #tpu.dot_dimension_numbers<[1], [0], [0], [1], [0, 0, 1, 1], [], []>} : vector<128x128xbf16>, vector<128x128xbf16>, vector<128x128xf32> -> vector<128x128xf32>
    %3 = arith.truncf %2 : vector<128x128xf32> to vector<128x128xbf16>
    %c0_3 = arith.constant 0 : index
    %c0_4 = arith.constant 0 : index
    %4 = vector.load %arg4[%c0_3, %c0_4] : memref<128x128xbf16, #tpu.memory_space<vmem>>, vector<128x128xbf16>
    tpu.vector_store %arg4[%c0_3, %c0_4], %3 {strides = array<i32>} : memref<128x128xbf16, #tpu.memory_space<vmem>>, vector<128x128xbf16>,
    return
  }
  func.func @transform_0(%arg0: i32, %arg1: i32) -> (i32, i32) {
    %c0_i32 = arith.constant 0 : i32
    %c0_i32_0 = arith.constant 0 : i32
    return %arg0, %c0_i32 : i32, i32
  }
  func.func @transform_1(%arg0: i32, %arg1: i32) -> (i32, i32) {
    %c0_i32 = arith.constant 0 : i32
    %c0_i32_0 = arith.constant 0 : i32
    return %c0_i32, %arg1 : i32, i32
  }
  func.func @transform_2(%arg0: i32, %arg1: i32) -> (i32, i32) {
    %c0_i32 = arith.constant 0 : i32
    return %arg0, %arg1 : i32, i32
  }
}

</mosaic_0001>

<bundles_post_ra>
// kernel: tpu_custom_call.1
= control target key start
LH: loop header
LB: loop body
LE: loop exit
PB: predicated region body
PF: predicated region fallthrough
CT: control target
= control target key end

     0   :  { %7 = vsyncpa [#allocation3], 0  ;;  %s648_s0 = inlined_call_operand.hbm [shape: bf16[128,128], index: 0, kind: input, shape index: {}]   ;;  %s649_s1 = inlined_call_operand.hbm [shape: bf16[128,128], index: 1, kind: input, shape index: {}]   ;;  %s650_s2 = inlined_call_operand.hbm [shape: bf16[128,128], index: 2, kind: output, shape index: {}]  }
   0x1   :  { %8 = vsyncpa [#allocation6], 0 }
   0x2   :  { %9 = vsyncpa [#allocation4], 0  ;;  %s610_s9 = smov [#allocation2]  }
   0x3   :  { %s15_s10 = sshll.u32 %s610_s9, 4  ;;  %s16_s10 = int_to_ptr.vmem [resolvable:$true] %s15_s10 }
   0x4   :  { %s552_s11 = scalar_lea.vmem %s16_s10, 1024  ;;  %p557_p1 = scmp.lt.s32.totalorder %s16_s10, %s16_s10 }
   0x5   :  { %p553_p0 = scmp.ne.s32.totalorder %s16_s10, %s552_s11  ;;  %p558_p2 = scmp.lt.s32.totalorder %s552_s11, %s552_s11 }
   0x7   :  { %p559_p3 = por %p558_p2, %p557_p1 }
   0x9   :  { %p560_p4 = pnand %p559_p3, %p553_p0 }
   0xb   :  { %563 = shalt.err (!%p560_p4)
}
   0xc   :  { %s611_s12 = smov 64   ;;  %s612_s13 = smov 4  }
   0xd   :  { %21 = dma.hbm_to_vmem [thread:$0]  %s648_s0, 1024, %s16_s10, [#allocation3], %s611_s12, %s611_s12, %s612_s13  }
   0xe   :  { %s613_s16 = smov [#allocation5]  }
   0xf   :  { %s27_s17 = sshll.u32 %s613_s16, 4  ;;  %s28_s17 = int_to_ptr.vmem [resolvable:$true] %s27_s17 }
  0x10   :  { %s572_s18 = scalar_lea.vmem %s28_s17, 1024  ;;  %p577_p6 = scmp.lt.s32.totalorder %s28_s17, %s28_s17 }
  0x11   :  { %p573_p5 = scmp.ne.s32.totalorder %s28_s17, %s572_s18  ;;  %p578_p7 = scmp.lt.s32.totalorder %s572_s18, %s572_s18 }
  0x13   :  { %p579_p8 = por %p578_p7, %p577_p6 }
  0x15   :  { %p580_p9 = pnand %p579_p8, %p573_p5 }
  0x17   :  { %583 = shalt.err (!%p580_p9)
}
  0x18   :  { %33 = dma.hbm_to_vmem [thread:$0]  %s649_s1, 1024, %s28_s17, [#allocation6], %s611_s12, %s611_s12, %s612_s13  }
  0x19   :  { %604 = dma.done.wait [#allocation3], 1024  }
  0x1a   :  { %605 = vsyncadd [#allocation3], 4294966272 }
  0x1b   :  { %606 = dma.done.wait [#allocation6], 1024  }
  0x1c   :  { %607 = vsyncadd [#allocation6], 4294966272  ;;  %v528_v0 = vld [vmem:[#allocation5 + $0x38] sm:$0xff]   ;;  %v529_v1 = vld [vmem:[#allocation5 + $0x30] sm:$0xff]   ;;  %s614_s0 = smov [#allocation7]  }
  0x1d   :  { %475 = vmatprep.subr.bf16.mxu0 %v528_v0  ;;  %507 = vmatprep.subr.bf16.mxu1 %v528_v0  ;;  %v530_v2 = vld [vmem:[#allocation5 + $0x28] sm:$0xff]   ;;  %v531_v3 = vld [vmem:[#allocation5 + $0x20] sm:$0xff]   ;;  %v532_v6 = vld [vmem:[#allocation5 + $0x18] sm:$0xff]   ;;  %s351_s1 = sshll.u32 %s614_s0, 4  ;;  %s352_s1 = int_to_ptr.vmem [resolvable:$true] %s351_s1 }
  0x1e   :  { %476 = vmatpush3.bf16.msra.mxu0 %v528_v0  ;;  %515 = vmatpush3.bf16.msra.mxu1 %v528_v0  ;;  %v536_v4 = vld [vmem:[#allocation2] sm:$0xff]   ;;  %v533_v7 = vld [vmem:[#allocation5 + $0x10] sm:$0xff]   ;;  %v534_v8 = vld [vmem:[#allocation5 + $0x8] sm:$0xff]   ;;  %s584_s21 = scalar_lea.vmem %s352_s1, 1024  ;;  %p589_p11 = scmp.lt.s32.totalorder %s352_s1, %s352_s1 }
  0x1f   :  { %477 = vmatprep.subr.bf16.mxu0 %v529_v1  ;;  %508 = vmatprep.subr.bf16.mxu1 %v529_v1  ;;  %v537_v5 = vld [vmem:[#allocation2 + $0x20] sm:$0xff]   ;;  %v538_v10 = vld [vmem:[#allocation2 + $0x8] sm:$0xff]   ;;  %v540_v12 = vld [vmem:[#allocation2 + $0x10] sm:$0xff]   ;;  %p585_p10 = scmp.ne.s32.totalorder %s352_s1, %s584_s21  ;;  %p590_p12 = scmp.lt.s32.totalorder %s584_s21, %s584_s21 }
  0x20   :  { %491 = vmatprep.mubr.bf16.mxu0 %v536_v4  ;;  %499 = vmatprep.mubr.bf16.mxu1 %v537_v5  ;;  %v535_v9 = vld [vmem:[#allocation5] sm:$0xff]   ;;  %v539_v11 = vld [vmem:[#allocation2 + $0x28] sm:$0xff]   ;;  %v541_v13 = vld [vmem:[#allocation2 + $0x30] sm:$0xff]  }
  0x21   :  { %v542_v14 = vld [vmem:[#allocation2 + $0x18] sm:$0xff]   ;;  %p591_p13 = por %p590_p12, %p589_p11 }
  0x22   :  { %478 = vmatpush3.bf16.msra.mxu0 %v529_v1  ;;  %516 = vmatpush3.bf16.msra.mxu1 %v529_v1  ;;  %v543_v15 = vld [vmem:[#allocation2 + $0x38] sm:$0xff]  }
  0x23   :  { %479 = vmatprep.subr.bf16.mxu0 %v530_v2  ;;  %509 = vmatprep.subr.bf16.mxu1 %v530_v2  ;;  %p592_p0 = pnand %p591_p13, %p585_p10 }
  0x26   :  { %480 = vmatpush3.bf16.msra.mxu0 %v530_v2  ;;  %517 = vmatpush3.bf16.msra.mxu1 %v530_v2 }
  0x27   :  { %481 = vmatprep.subr.bf16.mxu0 %v531_v3  ;;  %510 = vmatprep.subr.bf16.mxu1 %v531_v3 }
  0x2a   :  { %482 = vmatpush3.bf16.msra.mxu0 %v531_v3  ;;  %518 = vmatpush3.bf16.msra.mxu1 %v531_v3 }
  0x2b   :  { %483 = vmatprep.subr.bf16.mxu0 %v532_v6  ;;  %511 = vmatprep.subr.bf16.mxu1 %v532_v6 }
  0x2e   :  { %484 = vmatpush3.bf16.msra.mxu0 %v532_v6  ;;  %519 = vmatpush3.bf16.msra.mxu1 %v532_v6 }
  0x2f   :  { %485 = vmatprep.subr.bf16.mxu0 %v533_v7  ;;  %512 = vmatprep.subr.bf16.mxu1 %v533_v7 }
  0x32   :  { %486 = vmatpush3.bf16.msra.mxu0 %v533_v7  ;;  %520 = vmatpush3.bf16.msra.mxu1 %v533_v7 }
  0x33   :  { %487 = vmatprep.subr.bf16.mxu0 %v534_v8  ;;  %513 = vmatprep.subr.bf16.mxu1 %v534_v8 }
  0x36   :  { %488 = vmatpush3.bf16.msra.mxu0 %v534_v8  ;;  %521 = vmatpush3.bf16.msra.mxu1 %v534_v8 }
  0x37   :  { %489 = vmatprep.subr.bf16.mxu0 %v535_v9  ;;  %514 = vmatprep.subr.bf16.mxu1 %v535_v9 }
  0x3a   :  { %490 = vmatpush3.bf16.msra.mxu0 %v535_v9  ;;  %522 = vmatpush3.bf16.msra.mxu1 %v535_v9 }
  0x3d   :  { %492 = vmatmul.mubr.bf16.vlgmr.msra.gmra.mxu0 %v538_v10  ;;  %500 = vmatmul.mubr.bf16.vlgmr.msra.gmra.mxu1 %v539_v11 }
  0x3e   :  { %495 = vmatprep.mubr.bf16.mxu0 %v540_v12  ;;  %503 = vmatprep.mubr.bf16.mxu1 %v541_v13 }
  0x45   :  { %496 = vmatmul.mubr.bf16.gmra.mxu0 %v542_v14  ;;  %504 = vmatmul.mubr.bf16.gmra.mxu1 %v543_v15 }
  0xfd   :  { %v493_v16 = vpop.f32.mrf.mxu0  ;;  %v501_v17 = vpop.f32.mrf.mxu1 }
  0xff   :  { %v203_v18 = vpop.f32.mrf.mxu0  ;;  %v235_v19 = vpop.f32.mrf.mxu1 }
 0x101   :  { %v494_v20 = vpop.f32.mrf.mxu0  ;;  %v502_v21 = vpop.f32.mrf.mxu1 }
 0x102   :  { %v420_v22 = vpack.c.bf16 %v494_v20, %v493_v16  ;;  %v440_v23 = vpack.c.bf16 %v502_v21, %v501_v17 }
 0x103   :  { %v206_v24 = vpop.f32.mrf.mxu0  ;;  %v238_v25 = vpop.f32.mrf.mxu1 }
 0x104   :  { %452 = vst [vmem:[#allocation7 + $0x8] sm:$0xff] %v420_v22   ;;  %456 = vst [vmem:[#allocation7 + $0x28] sm:$0xff] %v440_v23   ;;  %v415_v26 = vpack.c.bf16 %v206_v24, %v203_v18  ;;  %v435_v27 = vpack.c.bf16 %v238_v25, %v235_v19 }
 0x105   :  { %v497_v28 = vpop.f32.mrf.mxu0  ;;  %v505_v29 = vpop.f32.mrf.mxu1 }
 0x106   :  { %416 = vst [vmem:[#allocation7] sm:$0xff] %v415_v26   ;;  %455 = vst [vmem:[#allocation7 + $0x20] sm:$0xff] %v435_v27  }
 0x107   :  { %v219_v30 = vpop.f32.mrf.mxu0  ;;  %v251_v31 = vpop.f32.mrf.mxu1 }
 0x109   :  { %v498_v32 = vpop.f32.mrf.mxu0  ;;  %v506_v33 = vpop.f32.mrf.mxu1 }
 0x10a   :  { %v430_v34 = vpack.c.bf16 %v498_v32, %v497_v28  ;;  %v450_v35 = vpack.c.bf16 %v506_v33, %v505_v29 }
 0x10b   :  { %v222_v36 = vpop.f32.mrf.mxu0  ;;  %v254_v37 = vpop.f32.mrf.mxu1 }
 0x10c   :  { %454 = vst [vmem:[#allocation7 + $0x18] sm:$0xff] %v430_v34   ;;  %458 = vst [vmem:[#allocation7 + $0x38] sm:$0xff] %v450_v35   ;;  %v425_v38 = vpack.c.bf16 %v222_v36, %v219_v30  ;;  %v445_v39 = vpack.c.bf16 %v254_v37, %v251_v31 }
 0x10e   :  { %453 = vst [vmem:[#allocation7 + $0x10] sm:$0xff] %v425_v38   ;;  %457 = vst [vmem:[#allocation7 + $0x30] sm:$0xff] %v445_v39  }
 0x10f   :  { %595 = shalt.err (!%p592_p0)
}
 0x110   :  { %357 = dma.vmem_to_hbm [thread:$0]  %s352_s1, 1024, %s650_s2, [#allocation4], %s611_s12, %s611_s12, %s612_s13  }
 0x111   :  { %608 = dma.done.wait [#allocation4], 1024  }
 0x112   :  { %609 = vsyncadd [#allocation4], 4294966272 }
 0x113   :  { %361 = vsyncpa [#allocation3], 1 }
 0x114   :  { %362 = vsyncpa [#allocation6], 1 }
 0x115   :  { %363 = vsyncpa [#allocation4], 1 }

</bundles_post_ra>
